<compile_context>
chip_gen: v7x
topology: tpu7x:2x2x1
jax: 0.10.0
libtpu: 0.0.40
codegen_flags: <defaults>
</compile_context>

<pallas_src>
import functools
import math

import jax
import jax.numpy as jnp
from jax import lax
from jax.experimental import pallas as pl
from jax.experimental.pallas import tpu as pltpu


# ----------------------------------------------------------------------------
# Helpers
# ----------------------------------------------------------------------------
def _row_tile(m, target=512):
    """Pick a token-dim tile: full array if small, else a (multiple-of-8) divisor."""
    if m <= target:
        return m
    for tm in (512, 256, 128, 64, 32, 16, 8):
        if m % tm == 0:
            return tm
    return m  # fallback: single block


# ----------------------------------------------------------------------------
# Kernels
# ----------------------------------------------------------------------------
def _linear_act_drop_kernel(x_ref, w_ref, b_ref, m_ref, o_ref):
    """relu((x @ w + b) * dropout_scale) on one (TM, K) row tile."""
    y = jnp.dot(x_ref[...], w_ref[...], preferred_element_type=jnp.float32)
    y = (y + b_ref[...]) * m_ref[...]
    o_ref[...] = jnp.maximum(y, 0.0)


def _linear_act_kernel(x_ref, w_ref, b_ref, o_ref):
    """relu(x @ w + b) (eval path, no dropout)."""
    y = jnp.dot(x_ref[...], w_ref[...], preferred_element_type=jnp.float32)
    o_ref[...] = jnp.maximum(y + b_ref[...], 0.0)


def _gates_single_kernel(x_ref, w_ref, b_ref, o_ref):
    """Precompute input gates for one direction: x @ W_ih_cat + b_ih -> (TM, 3H)."""
    o_ref[0] = (
        jnp.dot(x_ref[...], w_ref[0], preferred_element_type=jnp.float32) + b_ref[0]
    )


def _gates_dual_kernel(xf_ref, xb_ref, wt_ref, wb_ref, b_ref, o_ref):
    """Same, but the layer input is [fwd | bwd] of the previous layer (split-K,
    so no concatenate is ever materialized)."""
    o_ref[0] = (
        jnp.dot(xf_ref[...], wt_ref[0], preferred_element_type=jnp.float32)
        + jnp.dot(xb_ref[...], wb_ref[0], preferred_element_type=jnp.float32)
        + b_ref[0]
    )


def _gru_scan_kernel(gx_ref, whh_ref, bhh_ref, o_ref, h_ref, *, T, B, H):
    """One bidirectional GRU layer. grid=(2,) over direction (parallel);
    lax.fori_loop over T inside the kernel; hidden state in VMEM scratch.

    Per step (PyTorch gate order [r, z, n], input gates precomputed):
      gh = h @ W_hh_cat + b_hh
      r  = sigmoid(gx_r + gh_r)
      z  = sigmoid(gx_z + gh_z)
      n  = tanh   (gx_n + r * gh_n)
      h' = (1 - z) * n + z * h
    """
    d = pl.program_id(0)                 # 0 = forward, 1 = backward
    whh = whh_ref[0]                     # (H, 3H)   hoisted out of the loop
    bhh = jnp.broadcast_to(bhh_ref[0], (B, 3 * H))   # hoisted broadcast
    h_ref[...] = jnp.zeros_like(h_ref)   # h0 = 0 (re-init each direction)

    def step(s, carry):
        t = jnp.where(d == 0, s, T - 1 - s)          # time index for this direction
        gx = gx_ref[0, t]                            # (B, 3H) precomputed input gates
        h = h_ref[...]                               # (B, H)
        gh = jnp.dot(h, whh, preferred_element_type=jnp.float32) + bhh
        r = jax.nn.sigmoid(gx[:, 0:H] + gh[:, 0:H])
        z = jax.nn.sigmoid(gx[:, H:2 * H] + gh[:, H:2 * H])
        n = jnp.tanh(gx[:, 2 * H:] + r * gh[:, 2 * H:])
        h_new = (1.0 - z) * n + z * h
        h_ref[...] = h_new
        o_ref[0, t] = h_new                          # output at original time index
        return carry

    lax.fori_loop(0, T, step, 0)


def _dual_linear_kernel(xf_ref, xb_ref, wt_ref, wb_ref, b_ref, o_ref):
    """linear2 on the bidirectional output without materializing the concat."""
    o_ref[...] = (
        jnp.dot(xf_ref[...], wt_ref[...], preferred_element_type=jnp.float32)
        + jnp.dot(xb_ref[...], wb_ref[...], preferred_element_type=jnp.float32)
        + b_ref[...]
    )


# ----------------------------------------------------------------------------
# pallas_call wrappers
# ----------------------------------------------------------------------------
def linear1_act(x2d, w, b, mask=None):
    """relu(dropout(x @ w + b)); x2d: (M, K) time-major tokens; mask: (M, H) or None."""
    M, K = x2d.shape
    H = w.shape[1]
    TM = _row_tile(M)
    nm = M // TM
    x_spec = pl.BlockSpec((TM, K), lambda m: (m, 0))
    w_spec = pl.BlockSpec((K, H), lambda m: (0, 0))
    b_spec = pl.BlockSpec((1, H), lambda m: (0, 0))
    o_spec = pl.BlockSpec((TM, H), lambda m: (m, 0))
    if mask is not None:
        kernel = _linear_act_drop_kernel
        in_specs = [x_spec, w_spec, b_spec, pl.BlockSpec((TM, H), lambda m: (m, 0))]
        args = (x2d, w, b, mask)
    else:
        kernel = _linear_act_kernel
        in_specs = [x_spec, w_spec, b_spec]
        args = (x2d, w, b)
    return pl.pallas_call(
        kernel,
        out_shape=jax.ShapeDtypeStruct((M, H), jnp.float32),
        grid=(nm,),
        in_specs=in_specs,
        out_specs=o_spec,
        compiler_params=pltpu.CompilerParams(dimension_semantics=("parallel",)),
    )(*args)


def gates_from_single(x2d, wih, bih):
    """x2d: (M, K); wih: (2, K, 3H); bih: (2, 1, 3H) -> (2, M, 3H)."""
    M, K = x2d.shape
    G = wih.shape[-1]
    TM = _row_tile(M)
    nm = M // TM
    return pl.pallas_call(
        _gates_single_kernel,
        out_shape=jax.ShapeDtypeStruct((2, M, G), jnp.float32),
        grid=(2, nm),
        in_specs=[
            pl.BlockSpec((TM, K), lambda d, m: (m, 0)),
            pl.BlockSpec((1, K, G), lambda d, m: (d, 0, 0)),
            pl.BlockSpec((1, 1, G), lambda d, m: (d, 0, 0)),
        ],
        out_specs=pl.BlockSpec((1, TM, G), lambda d, m: (d, m, 0)),
        compiler_params=pltpu.CompilerParams(
            dimension_semantics=("parallel", "parallel")),
    )(x2d, wih, bih)


def gates_from_dual(xf, xb, wih_top, wih_bot, bih):
    """xf/xb: (M, H) fwd/bwd halves of previous layer; weights split along K."""
    M, H = xf.shape
    G = wih_top.shape[-1]
    TM = _row_tile(M)
    nm = M // TM
    return pl.pallas_call(
        _gates_dual_kernel,
        out_shape=jax.ShapeDtypeStruct((2, M, G), jnp.float32),
        grid=(2, nm),
        in_specs=[
            pl.BlockSpec((TM, H), lambda d, m: (m, 0)),
            pl.BlockSpec((TM, H), lambda d, m: (m, 0)),
            pl.BlockSpec((1, H, G), lambda d, m: (d, 0, 0)),
            pl.BlockSpec((1, H, G), lambda d, m: (d, 0, 0)),
            pl.BlockSpec((1, 1, G), lambda d, m: (d, 0, 0)),
        ],
        out_specs=pl.BlockSpec((1, TM, G), lambda d, m: (d, m, 0)),
        compiler_params=pltpu.CompilerParams(
            dimension_semantics=("parallel", "parallel")),
    )(xf, xb, wih_top, wih_bot, bih)


def gru_layer(gx, whh, bhh):
    """gx: (2, T, B, 3H) precomputed input gates; whh: (2, H, 3H); bhh: (2, 1, 3H)
    -> (2, T, B, H) direction-major outputs (fwd = [0], bwd = [1])."""
    _, T, B, G = gx.shape
    H = G // 3
    kernel = functools.partial(_gru_scan_kernel, T=T, B=B, H=H)
    return pl.pallas_call(
        kernel,
        out_shape=jax.ShapeDtypeStruct((2, T, B, H), jnp.float32),
        grid=(2,),
        in_specs=[
            pl.BlockSpec((1, T, B, G), lambda d: (d, 0, 0, 0)),
            pl.BlockSpec((1, H, G), lambda d: (d, 0, 0)),
            pl.BlockSpec((1, 1, G), lambda d: (d, 0, 0)),
        ],
        out_specs=pl.BlockSpec((1, T, B, H), lambda d: (d, 0, 0, 0)),
        scratch_shapes=[pltpu.VMEM((B, H), jnp.float32)],
        compiler_params=pltpu.CompilerParams(dimension_semantics=("parallel",)),
    )(gx, whh, bhh)


def dual_linear(xf, xb, w_top, w_bot, b):
    """linear2: out = [xf | xb] @ W2 + b2, with W2 split along K (no concat)."""
    M, H = xf.shape
    N = w_top.shape[1]
    TM = _row_tile(M)
    nm = M // TM
    return pl.pallas_call(
        _dual_linear_kernel,
        out_shape=jax.ShapeDtypeStruct((M, N), jnp.float32),
        grid=(nm,),
        in_specs=[
            pl.BlockSpec((TM, H), lambda m: (m, 0)),
            pl.BlockSpec((TM, H), lambda m: (m, 0)),
            pl.BlockSpec((H, N), lambda m: (0, 0)),
            pl.BlockSpec((H, N), lambda m: (0, 0)),
            pl.BlockSpec((1, N), lambda m: (0, 0)),
        ],
        out_specs=pl.BlockSpec((TM, N), lambda m: (m, 0)),
        compiler_params=pltpu.CompilerParams(dimension_semantics=("parallel",)),
    )(xf, xb, w_top, w_bot, b)


# ----------------------------------------------------------------------------
# Parameters & full forward
# ----------------------------------------------------------------------------
def init_params(key, n_input, n_output, n_hidden, n_rnn_layer=2):
    """Weights stored pre-transposed / gate-concatenated for the kernels.
    Gate column order inside every 3H block is PyTorch's [r | z | n]."""
    H = n_hidden
    k = 1.0 / math.sqrt(H)
    keys = iter(jax.random.split(key, 4 + n_rnn_layer * 2 * 4))

    def u(shape):
        return jax.random.uniform(next(keys), shape, jnp.float32, -k, k)

    params = {
        "w1": u((n_input, H)),            # linear1.weight.T
        "b1": u((1, H)),
        "b2": u((1, n_output)),
        "gru": [],
    }
    w2 = u((2 * H, n_output))             # linear2.weight.T, rows = [fwd | bwd]
    params["w2_top"] = w2[:H]
    params["w2_bot"] = w2[H:]

    for layer in range(n_rnn_layer):
        in_l = H if layer == 0 else 2 * H
        wih, whh, bih, bhh = [], [], [], []
        for _d in range(2):               # 0 = fwd, 1 = bwd (_reverse)
            wih.append(u((in_l, 3 * H)))  # weight_ih_l{k}.T  (gates concatenated)
            whh.append(u((H, 3 * H)))     # weight_hh_l{k}.T
            bih.append(u((1, 3 * H)))
            bhh.append(u((1, 3 * H)))
        wih = jnp.stack(wih)
        lp = {"whh": jnp.stack(whh), "bih": jnp.stack(bih), "bhh": jnp.stack(bhh)}
        if layer == 0:
            lp["wih"] = wih                       # (2, H, 3H)
        else:
            lp["wih_top"] = wih[:, :H, :]         # consumes fwd half of prev layer
            lp["wih_bot"] = wih[:, H:, :]         # consumes bwd half of prev layer
        params["gru"].append(lp)
    return params


def rnn_forward(params, x, *, dropout_mask=None, p=0.5, training=True,
                dropout_rng=None):
    """x: (B, T, n_input) -> (B, T, n_output).  dropout_mask (optional): (B*T, H)
    scale array in time-major token order with values {0, 1/(1-p)}."""
    B, T, n_input = x.shape
    H = params["w1"].shape[1]
    M = B * T

    # Time-major token layout once up front; everything downstream stays in it.
    x2d = x.transpose(1, 0, 2).reshape(M, n_input)

    mask = None
    if training and p > 0.0:
        if dropout_mask is None:
            rng = dropout_rng if dropout_rng is not None else jax.random.PRNGKey(0)
            keep = jax.random.bernoulli(rng, 1.0 - p, (M, H))
            dropout_mask = keep.astype(jnp.float32) * (1.0 / (1.0 - p))
        mask = dropout_mask

    # linear1 + dropout + relu (fused, tiled over tokens)
    h2d = linear1_act(x2d, params["w1"], params["b1"], mask)

    # GRU: per layer, precompute input gates for ALL timesteps with one big matmul,
    # then run the serial recurrence with only the hidden matmul inside the loop.
    xf = xb = None
    for li, layer in enumerate(params["gru"]):
        if li == 0:
            gx = gates_from_single(h2d, layer["wih"], layer["bih"])
        else:
            gx = gates_from_dual(xf, xb, layer["wih_top"], layer["wih_bot"],
                                 layer["bih"])
        out = gru_layer(gx.reshape(2, T, B, 3 * H), layer["whh"], layer["bhh"])
        xf = out[0].reshape(M, H)   # fwd-direction outputs, (T*B, H)
        xb = out[1].reshape(M, H)   # bwd-direction outputs, (T*B, H)

    # linear2 on [fwd | bwd] via split-K (no concatenate materialized)
    y2d = dual_linear(xf, xb, params["w2_top"], params["w2_bot"], params["b2"])
    return y2d.reshape(T, B, -1).transpose(1, 0, 2)


# ----------------------------------------------------------------------------
# Pure-JAX reference (for validation)
# ----------------------------------------------------------------------------
def reference_forward(params, x, mask):
    with jax.default_matmul_precision("highest"):
        B, T, n_input = x.shape
        H = params["w1"].shape[1]
        M = B * T
        x2d = x.transpose(1, 0, 2).reshape(M, n_input)
        h2d = x2d @ params["w1"] + params["b1"]
        if mask is not None:
            h2d = h2d * mask
        h = jnp.maximum(h2d, 0.0).reshape(T, B, H)

        def run_dir(gx, whh, bhh):
            def step(hprev, g):
                gh = hprev @ whh + bhh
                r = jax.nn.sigmoid(g[:, :H] + gh[:, :H])
                z = jax.nn.sigmoid(g[:, H:2 * H] + gh[:, H:2 * H])
                n = jnp.tanh(g[:, 2 * H:] + r * gh[:, 2 * H:])
                hn = (1.0 - z) * n + z * hprev
                return hn, hn
            _, outs = lax.scan(step, jnp.zeros((B, H), jnp.float32), gx)
            return outs

        out_f = out_b = None
        for li, layer in enumerate(params["gru"]):
            if li == 0:
                gx_f = jnp.einsum("tbk,kg->tbg", h, layer["wih"][0]) + layer["bih"][0]
                gx_b = jnp.einsum("tbk,kg->tbg", h, layer["wih"][1]) + layer["bih"][1]
            else:
                gx_f = (jnp.einsum("tbk,kg->tbg", out_f, layer["wih_top"][0])
                        + jnp.einsum("tbk,kg->tbg", out_b, layer["wih_bot"][0])
                        + layer["bih"][0])
                gx_b = (jnp.einsum("tbk,kg->tbg", out_f, layer["wih_top"][1])
                        + jnp.einsum("tbk,kg->tbg", out_b, layer["wih_bot"][1])
                        + layer["bih"][1])
            out_f = run_dir(gx_f, layer["whh"][0], layer["bhh"][0])
            out_b = run_dir(gx_b[::-1], layer["whh"][1], layer["bhh"][1])[::-1]

        y = (jnp.einsum("tbk,kn->tbn", out_f, params["w2_top"])
             + jnp.einsum("tbk,kn->tbn", out_b, params["w2_bot"])
             + params["b2"])
        return y.transpose(1, 0, 2)


# ----------------------------------------------------------------------------
if __name__ == "__main__":
    n_input, n_hidden, n_output, n_rnn_layer = 16, 32, 24, 2
    B, T = 2, 8
    p = 0.5

    key = jax.random.PRNGKey(0)
    pkey, xkey, dkey = jax.random.split(key, 3)
    params = init_params(pkey, n_input, n_output, n_hidden, n_rnn_layer)
    x = jax.random.normal(xkey, (B, T, n_input), jnp.float32)

    # Dropout mask generated outside the kernel (semantically equivalent to
    # F.dropout(p=0.5, training=True); not bit-identical to PyTorch's RNG stream).
    keep = jax.random.bernoulli(dkey, 1.0 - p, (B * T, n_hidden))
    mask = keep.astype(jnp.float32) * (1.0 / (1.0 - p))

    out = rnn_forward(params, x, dropout_mask=mask, p=p, training=True)
    out = jax.block_until_ready(out)
    assert out.shape == (B, T, n_output), out.shape
    assert bool(jnp.all(jnp.isfinite(out)))

    ref = reference_forward(params, x, mask)
    max_err = float(jnp.max(jnp.abs(out - ref)))
    assert bool(jnp.allclose(out, ref, rtol=2e-3, atol=2e-3)), max_err

    print("KERNEL_OK")
</pallas_src>

<mosaic_0001>
module attributes {stable_mosaic.version = 11 : i64} {
  func.func @_linear_act_drop_kernel(%arg0: i32, %arg1: memref<16x16xf32, #tpu.memory_space<vmem>>, %arg2: memref<16x32xf32, #tpu.memory_space<vmem>>, %arg3: memref<1x32xf32, #tpu.memory_space<vmem>>, %arg4: memref<16x32xf32, #tpu.memory_space<vmem>>, %arg5: memref<16x32xf32, #tpu.memory_space<vmem>>) attributes {dimension_semantics = [#tpu.dimension_semantics<parallel>], iteration_bounds = array<i64: 1>, scalar_prefetch = 0 : i64, scratch_operands = 0 : i64, tpu.core_type = #tpu.core_type<tc>, window_params = [{transform_indices = @transform_0, window_bounds = array<i64: 16, 16>}, {pipeline_mode = #tpu.pipeline_mode<synchronous>, transform_indices = @transform_1, window_bounds = array<i64: 16, 32>}, {pipeline_mode = #tpu.pipeline_mode<synchronous>, transform_indices = @transform_2, window_bounds = array<i64: 1, 32>}, {transform_indices = @transform_3, window_bounds = array<i64: 16, 32>}, {transform_indices = @transform_4, window_bounds = array<i64: 16, 32>}]} {
    %c0 = arith.constant 0 : index
    %c0_0 = arith.constant 0 : index
    %0 = vector.load %arg1[%c0, %c0_0] : memref<16x16xf32, #tpu.memory_space<vmem>>, vector<16x16xf32>
    %c0_1 = arith.constant 0 : index
    %c0_2 = arith.constant 0 : index
    %1 = vector.load %arg2[%c0_1, %c0_2] : memref<16x32xf32, #tpu.memory_space<vmem>>, vector<16x32xf32>
    %cst = arith.constant dense<0.000000e+00> : vector<16x32xf32>
    %2 = tpu.matmul %0, %1, %cst {dimension_numbers = #tpu.dot_dimension_numbers<[1], [0], [0], [1], [0, 0, 1, 1], [], []>} : vector<16x16xf32>, vector<16x32xf32>, vector<16x32xf32> -> vector<16x32xf32>
    %c0_3 = arith.constant 0 : index
    %c0_4 = arith.constant 0 : index
    %3 = vector.load %arg3[%c0_3, %c0_4] : memref<1x32xf32, #tpu.memory_space<vmem>>, vector<1x32xf32>
    %4 = vector.broadcast %3 : vector<1x32xf32> to vector<16x32xf32>
    %5 = arith.addf %2, %4 : vector<16x32xf32>
    %c0_5 = arith.constant 0 : index
    %c0_6 = arith.constant 0 : index
    %6 = vector.load %arg4[%c0_5, %c0_6] : memref<16x32xf32, #tpu.memory_space<vmem>>, vector<16x32xf32>
    %7 = arith.mulf %5, %6 : vector<16x32xf32>
    %cst_7 = arith.constant 0.000000e+00 : f32
    %8 = vector.broadcast %cst_7 : f32 to vector<16x32xf32>
    %9 = arith.maximumf %7, %8 : vector<16x32xf32>
    %c0_8 = arith.constant 0 : index
    %c0_9 = arith.constant 0 : index
    %10 = vector.load %arg5[%c0_8, %c0_9] : memref<16x32xf32, #tpu.memory_space<vmem>>, vector<16x32xf32>
    tpu.vector_store %arg5[%c0_8, %c0_9], %9 {strides = array<i32>} : memref<16x32xf32, #tpu.memory_space<vmem>>, vector<16x32xf32>,
    return
  }
  func.func @transform_0(%arg0: i32) -> (i32, i32) {
    %c0_i32 = arith.constant 0 : i32
    %c0_i32_0 = arith.constant 0 : i32
    return %arg0, %c0_i32 : i32, i32
  }
  func.func @transform_1(%arg0: i32) -> (i32, i32) {
    %c0_i32 = arith.constant 0 : i32
    %c0_i32_0 = arith.constant 0 : i32
    %c0_i32_1 = arith.constant 0 : i32
    return %c0_i32, %c0_i32_0 : i32, i32
  }
  func.func @transform_2(%arg0: i32) -> (i32, i32) {
    %c0_i32 = arith.constant 0 : i32
    %c0_i32_0 = arith.constant 0 : i32
    %c0_i32_1 = arith.constant 0 : i32
    return %c0_i32, %c0_i32_0 : i32, i32
  }
  func.func @transform_3(%arg0: i32) -> (i32, i32) {
    %c0_i32 = arith.constant 0 : i32
    %c0_i32_0 = arith.constant 0 : i32
    return %arg0, %c0_i32 : i32, i32
  }
  func.func @transform_4(%arg0: i32) -> (i32, i32) {
    %c0_i32 = arith.constant 0 : i32
    %c0_i32_0 = arith.constant 0 : i32
    return %arg0, %c0_i32 : i32, i32
  }
}

</mosaic_0001>

<bundles_post_ra>
// kernel: tpu_custom_call.1
= control target key start
LH: loop header
LB: loop body
LE: loop exit
PB: predicated region body
PF: predicated region fallthrough
CT: control target
= control target key end

     0   :  { %9 = vsyncpa [#allocation3], 0  ;;  %s398_s0 = inlined_call_operand.hbm [shape: f32[16,16], index: 0, kind: input, shape index: {}]   ;;  %s399_s1 = inlined_call_operand.hbm [shape: f32[16,32], index: 1, kind: input, shape index: {}]   ;;  %s400_s2 = inlined_call_operand.vmem [shape: f32[1,32], index: 2, kind: input, shape index: {}]   ;;  %s401_s3 = inlined_call_operand.hbm [shape: f32[16,32], index: 3, kind: input, shape index: {}]   ;;  %s402_s4 = inlined_call_operand.hbm [shape: f32[16,32], index: 4, kind: output, shape index: {}]  }
   0x1   :  { %10 = vsyncpa [#allocation6], 0 }
   0x2   :  { %11 = vsyncpa [#allocation4], 0  ;;  %s297_s15 = smov [#allocation5]   ;;  %s298_s17 = smov [#allocation2]  }
   0x3   :  { %s29_s16 = sshll.u32 %s297_s15, 4  ;;  %s17_s18 = sshll.u32 %s298_s17, 4  ;;  %s30_s16 = int_to_ptr.vmem [resolvable:$true] %s29_s16  ;;  %s328_s18 = int_to_ptr.vmem [resolvable:$true] %s17_s18 }
   0x4   :  { %s203_s21 = scalar_lea.hbm %s399_s1, 256 }
   0x5   :  { %p204_p0 = scmp.ne.s32.totalorder %s399_s1, %s203_s21  ;;  %p207_p1 = scmp.lt.u32.totalorder %s203_s21, %s399_s1 }
   0x7   :  { %p209_p2 = pnand %p207_p1, %p204_p0 }
   0x9   :  { %212 = shalt.err (!%p209_p2)
}
   0xa   :  { %s213_s26 = scalar_lea.vmem %s30_s16, 256  ;;  %p218_p4 = scmp.lt.s32.totalorder %s30_s16, %s30_s16 }
   0xb   :  { %p214_p3 = scmp.ne.s32.totalorder %s30_s16, %s213_s26  ;;  %p219_p5 = scmp.lt.s32.totalorder %s213_s26, %s213_s26 }
   0xd   :  { %p220_p6 = por %p219_p5, %p218_p4 }
   0xf   :  { %p221_p7 = pnand %p220_p6, %p214_p3 }
  0x11   :  { %224 = shalt.err (!%p221_p7)
}
  0x12   :  { %s299_s27 = smov 128   ;;  %s300_s28 = smov 8  }
  0x13   :  { %35 = dma.hbm_to_vmem [thread:$0]  %s399_s1, 256, %s30_s16, [#allocation6], %s299_s27, %s299_s27, %s300_s28  }
  0x14   :  { %s225_s7 = scalar_lea.hbm %s398_s0, 256 }
  0x15   :  { %p226_p8 = scmp.ne.s32.totalorder %s398_s0, %s225_s7  ;;  %p229_p9 = scmp.lt.u32.totalorder %s225_s7, %s398_s0 }
  0x17   :  { %p231_p10 = pnand %p229_p9, %p226_p8 }
  0x19   :  { %234 = shalt.err (!%p231_p10)
}
  0x1a   :  { %s235_s12 = scalar_lea.vmem %s328_s18, 256  ;;  %p240_p12 = scmp.lt.s32.totalorder %s328_s18, %s328_s18 }
  0x1b   :  { %p236_p11 = scmp.ne.s32.totalorder %s328_s18, %s235_s12  ;;  %p241_p13 = scmp.lt.s32.totalorder %s235_s12, %s235_s12 }
  0x1d   :  { %p242_p0 = por %p241_p13, %p240_p12 }
  0x1f   :  { %p243_p1 = pnand %p242_p0, %p236_p11 }
  0x21   :  { %246 = shalt.err (!%p243_p1)
}
  0x22   :  { %23 = dma.hbm_to_vmem [thread:$0]  %s398_s0, 256, %s328_s18, [#allocation3], %s299_s27, %s299_s27, %s300_s28  }
  0x23   :  { %s301_s14 = smov [#allocation7]   ;;  %s247_s19 = scalar_lea.hbm %s401_s3, 256 }
  0x24   :  { %s43_s15 = sshll.u32 %s301_s14, 4  ;;  %p248_p2 = scmp.ne.s32.totalorder %s401_s3, %s247_s19  ;;  %s44_s15 = int_to_ptr.vmem [resolvable:$true] %s43_s15 }
  0x25   :  { %p251_p3 = scmp.lt.u32.totalorder %s247_s19, %s401_s3 }
  0x27   :  { %p253_p4 = pnand %p251_p3, %p248_p2 }
  0x29   :  { %256 = shalt.err (!%p253_p4)
}
  0x2a   :  { %s257_s24 = scalar_lea.vmem %s44_s15, 256  ;;  %p262_p6 = scmp.lt.s32.totalorder %s44_s15, %s44_s15 }
  0x2b   :  { %p258_p5 = scmp.ne.s32.totalorder %s44_s15, %s257_s24  ;;  %p263_p7 = scmp.lt.s32.totalorder %s257_s24, %s257_s24 }
  0x2d   :  { %p264_p8 = por %p263_p7, %p262_p6 }
  0x2f   :  { %p265_p9 = pnand %p264_p8, %p258_p5 }
  0x31   :  { %268 = shalt.err (!%p265_p9)
}
  0x32   :  { %49 = dma.hbm_to_vmem [thread:$0]  %s401_s3, 256, %s44_s15, [#allocation6], %s299_s27, %s299_s27, %s300_s28  }
  0x33   :  { %291 = dma.done.wait [#allocation3], 256  }
  0x34   :  { %292 = vsyncadd [#allocation3], 4294967040 }
  0x35   :  { %293 = dma.done.wait [#allocation6], 512  }
  0x36   :  { %294 = vsyncadd [#allocation6], 4294966784  ;;  %vm70_vm0 = vcmask 130048   ;;  %v61_v0 = vld [vmem:[#allocation5] sm:$0xff]  ;;  %v62_v1 = vld [vmem:[#allocation5 + $0x8] sm:$0xff]  ;;  %s302_s3 = smov [#allocation8]  }
  0x37   :  { %v59_v2 = vld [vmem:[#allocation2] sm:$0xff]  ;;  %v193_v3 = vpack.c.bf16 %v62_v1, %v61_v0  ;;  %v60_v4 = vld [vmem:[#allocation2 + $0x8] sm:$0xff]  ;;  %s166_s29 = sshll.u32 %s302_s3, 4  ;;  %vm158_vm1 = vcmask 261120   ;;  %s167_s29 = int_to_ptr.vmem [resolvable:$true] %s166_s29 }
  0x38   :  { %190 = vmatprep.mubr.msk.f32.mxu0 %vm70_vm0, %v59_v2  ;;  %v179_v5 = vld [vmem:[%s400_s2] ss:$0 sm:$0xff]  ;;  %v153_v7 = vld [vmem:[#allocation7 + $0x8] sm:$0xff]  ;;  %s269_s30 = scalar_lea.vmem %s167_s29, 256  ;;  %p274_p11 = scmp.lt.s32.totalorder %s167_s29, %s167_s29 }
  0x39   :  { %194 = vmatprep.subr.bf16.mxu0 %v193_v3  ;;  %v152_v10 = vld [vmem:[#allocation7] sm:$0xff]  ;;  %p270_p10 = scmp.ne.s32.totalorder %s167_s29, %s269_s30  ;;  %p275_p12 = scmp.lt.s32.totalorder %s269_s30, %s269_s30 }
  0x3a   :  { %196 = vmatpush3.bf16.msra.mxu0 %v193_v3 }
  0x3b   :  { %p276_p13 = por %p275_p12, %p274_p11 }
  0x3d   :  { %191 = vmatmul.mubr.msk.f32.vlgmr.msra.gmra.mrb[0].mxu0 %vm70_vm0, %v60_v4  ;;  %p277_p0 = pnand %p276_p13, %p270_p10 }
 0x110   :  { %v192_v6 = vpop.f32.mrb[0].mxu0 }
 0x111   :  { %v149_v8 = vadd.f32 %v192_v6, %v179_v5  ;;  %v143_v9 = vpop.f32.mrb[1].mxu0 }
 0x112   :  { %v144_v11 = vadd.f32 %v179_v5, %v143_v9 }
 0x113   :  { %v155_v12 = vmul.f32 %v153_v7, %v149_v8 }
 0x114   :  { %v154_v13 = vmul.f32 %v152_v10, %v144_v11 }
 0x115   :  { %v157_v14 = vmax.f32 %v155_v12, 0.0 }
 0x116   :  { %v156_v15 = vmax.f32 %v154_v13, 0.0 }
 0x117   :  { %160 = vst.msk [vmem:[#allocation8 + $0x8] sm:$0xff] %vm158_vm1, %v157_v14 }
 0x118   :  { %159 = vst.msk [vmem:[#allocation8] sm:$0xff] %vm158_vm1, %v156_v15 }
 0x119   :  { %280 = shalt.err (!%p277_p0)
}
 0x11a   :  { %s281_s6 = scalar_lea.hbm %s402_s4, 256 }
 0x11b   :  { %p282_p1 = scmp.ne.s32.totalorder %s402_s4, %s281_s6  ;;  %p285_p2 = scmp.lt.u32.totalorder %s281_s6, %s402_s4 }
 0x11d   :  { %p287_p3 = pnand %p285_p2, %p282_p1 }
 0x11f   :  { %290 = shalt.err (!%p287_p3)
}
 0x120   :  { %172 = dma.vmem_to_hbm [thread:$0]  %s167_s29, 256, %s402_s4, [#allocation4], %s299_s27, %s299_s27, %s300_s28  }
 0x121   :  { %295 = dma.done.wait [#allocation4], 256  }
 0x122   :  { %296 = vsyncadd [#allocation4], 4294967040 }
 0x123   :  { %176 = vsyncpa [#allocation3], 1 }
 0x124   :  { %177 = vsyncpa [#allocation6], 1 }
 0x125   :  { %178 = vsyncpa [#allocation4], 1 }

</bundles_post_ra>
